<compile_context>
chip_gen: v7x
topology: tpu7x:2x2x1
jax: 0.10.0
libtpu: 0.0.40
codegen_flags: <defaults>
</compile_context>

<pallas_src>
import jax
import jax.numpy as jnp
from jax.experimental import pallas as pl
from jax.experimental.pallas import tpu as pltpu


def _round_up(x, m):
    return (x + m - 1) // m * m


def _ltn_kernel(x_ref, s_ref, bias_ref, out_ref):
    """One batch tile.

    x_ref   : (TILE_B, P_pad) bf16 raw logits (padded cols are 0 -> sigmoid 0.5,
              nulled by zero sign rows).
    s_ref   : (P_pad, C_pad) bf16 transposed/padded sign matrix ({-1,0,1}).
    bias_ref: (1, C_pad) f32; #negated literals per real clause, 1.0 for padded
              clauses so they evaluate to exactly 1.0 (log 0 contribution).
    out_ref : (TILE_B, 1) f32 satisfaction column for this tile.
    """
    # Truth values: f32 sigmoid (EUP), bf16 operand for the MXU.
    t = jax.nn.sigmoid(x_ref[...].astype(jnp.float32))              # (TILE_B, P_pad)
    t_bf = t.astype(jnp.bfloat16)

    # Clause pre-activation on the MXU + f32 broadcast bias on the VPU:
    #   pre[b,c] = sum_{p in pos(c)} t[b,p] + sum_{p in neg(c)} (1 - t[b,p])
    pre = jnp.dot(t_bf, s_ref[...], preferred_element_type=jnp.float32)
    pre = pre + bias_ref[...]                                        # (TILE_B, C_pad)

    # Lukasiewicz strong disjunction per clause (pre >= 0 up to bf16 rounding).
    clause = jnp.clip(pre, 0.0, 1.0)

    # Product t-norm over clauses via exp(sum(log(.))), all in f32.
    # Padded clauses are exactly 1.0 -> log(1) = 0 -> no effect.
    logc = jnp.log(jnp.maximum(clause, 1e-30))                       # (TILE_B, C_pad)
    logsum = jnp.sum(logc, axis=-1, keepdims=True)                   # (TILE_B, 1) XLU
    out_ref[...] = jnp.exp(logsum)


def ltn_model_forward(truth_values, sign_matrix, *, vmem_budget_bytes=24 << 20):
    """LTNModel forward.

    truth_values: (B, P) raw logits (sigmoid applied in-kernel).
    sign_matrix : (C, P) in {-1, 0, +1}; one row per CNF clause.
    Returns     : (B, 1) satisfaction values in [0, 1].
    """
    B, P = truth_values.shape
    C, P2 = sign_matrix.shape
    assert P == P2

    # ---- pad formula dims to TPU-native tile sizes -------------------------
    P_pad = _round_up(P, 128)
    C_pad = _round_up(C, 128)

    # ---- batch tile size: VMEM-budget aware, >= 2 tiles for v7x megacore ---
    s_bytes = P_pad * C_pad * 2 + C_pad * 4          # resident sign matrix + bias
    x_tile_bytes_per_row = 2 * P_pad * 2             # double-buffered bf16 x row
    max_tile_b = max(8, (vmem_budget_bytes - s_bytes) // x_tile_bytes_per_row)
    max_tile_b = min(4096, max_tile_b // 8 * 8)
    # TODO(synk): if s_bytes alone were >= the VMEM budget (huge formulas), a
    # C-tiling "arbitrary" grid axis with a log-sum accumulator would be needed.

    if B <= 16:
        tile_b = _round_up(B, 8)                      # tiny: one tile
    elif B <= 2 * max_tile_b:
        tile_b = _round_up(-(-B // 2), 8)             # two tiles -> both v7x TCs
    else:
        tile_b = max_tile_b                           # streaming tiles
    b_pad = _round_up(B, tile_b)
    num_tiles = b_pad // tile_b

    # ---- inputs: fused pad + bf16 cast (skip pad when already aligned) -----
    x_bf = truth_values.astype(jnp.bfloat16)
    if b_pad != B or P_pad != P:
        x_in = jnp.pad(x_bf, ((0, b_pad - B), (0, P_pad - P)))
    else:
        x_in = x_bf

    sign = sign_matrix.astype(jnp.float32)                           # (C, P)
    neg_count = jnp.sum(sign < 0, axis=1).astype(jnp.float32)        # (C,)
    # Bias per clause: negcnt for real clauses, 1.0 for padded clauses so they
    # evaluate to exactly 1.0 and drop out of the product aggregation.
    bias = jnp.concatenate(
        [neg_count, jnp.ones((C_pad - C,), jnp.float32)]).reshape(1, C_pad)

    s_pad = jnp.zeros((P_pad, C_pad), jnp.float32)
    s_pad = s_pad.at[:P, :C].set(sign.T)
    s_bf = s_pad.astype(jnp.bfloat16)                 # {-1,0,1} exact in bf16

    cost = pl.CostEstimate(
        flops=2 * b_pad * P_pad * C_pad,
        transcendentals=b_pad * (P_pad + 2 * C_pad),
        bytes_accessed=b_pad * P_pad * 2 + P_pad * C_pad * 2 + C_pad * 4 + b_pad * 4,
    )

    out = pl.pallas_call(
        _ltn_kernel,
        out_shape=jax.ShapeDtypeStruct((b_pad, 1), jnp.float32),
        grid=(num_tiles,),
        in_specs=[
            pl.BlockSpec((tile_b, P_pad), lambda i: (i, 0)),   # stream batch tiles
            pl.BlockSpec((P_pad, C_pad), lambda i: (0, 0)),    # VMEM-resident formula
            pl.BlockSpec((1, C_pad), lambda i: (0, 0)),        # VMEM-resident bias
        ],
        out_specs=pl.BlockSpec((tile_b, 1), lambda i: (i, 0)),
        compiler_params=pltpu.CompilerParams(
            dimension_semantics=("parallel",),   # independent tiles; 2x on v7x
        ),
        cost_estimate=cost,
    )(x_in, s_bf, bias)

    return out[:B]


if __name__ == "__main__":
    key = jax.random.PRNGKey(0)
    k_x, k_f = jax.random.split(key)

    B, P, C = 8, 32, 16   # batch, predicates, clauses (small synthetic shapes)

    # Deterministic example inputs (raw logits; sigmoid is applied in-kernel).
    x = jax.random.normal(k_x, (B, P), dtype=jnp.float32)

    # Deterministic sparse-ish "formula": a few positive/negated literals/clause.
    r = jax.random.uniform(k_f, (C, P))
    sign_matrix = jnp.where(r < 0.08, -1.0, 0.0) + jnp.where(r > 0.92, 1.0, 0.0)

    out = ltn_model_forward(x, sign_matrix)
    out = jax.block_until_ready(out)

    # Pure-JAX f32 reference of the same grounding (tolerance for bf16 MXU path).
    t_ref = jax.nn.sigmoid(x)
    neg_ref = jnp.sum(sign_matrix < 0, axis=1).astype(jnp.float32)
    clause_ref = jnp.clip(t_ref @ sign_matrix.T + neg_ref[None, :], 0.0, 1.0)
    ref = jnp.prod(clause_ref, axis=1, keepdims=True)

    assert out.shape == (B, 1)
    assert bool(jnp.all(jnp.isfinite(out)))
    assert bool(jnp.all(out >= 0.0)) and bool(jnp.all(out <= 1.0 + 1e-6))
    assert bool(jnp.allclose(out, ref, rtol=0.1, atol=1e-2))

    print("KERNEL_OK")
</pallas_src>

<mosaic_0001>
module attributes {stable_mosaic.version = 11 : i64} {
  func.func @_ltn_kernel(%arg0: i32, %arg1: memref<8x128xbf16, #tpu.memory_space<vmem>>, %arg2: memref<128x128xbf16, #tpu.memory_space<vmem>>, %arg3: memref<1x128xf32, #tpu.memory_space<vmem>>, %arg4: memref<8x1xf32, #tpu.memory_space<vmem>>) attributes {dimension_semantics = [#tpu.dimension_semantics<parallel>], iteration_bounds = array<i64: 1>, scalar_prefetch = 0 : i64, scratch_operands = 0 : i64, tpu.core_type = #tpu.core_type<tc>, window_params = [{transform_indices = @transform_0, window_bounds = array<i64: 8, 128>}, {pipeline_mode = #tpu.pipeline_mode<synchronous>, transform_indices = @transform_1, window_bounds = array<i64: 128, 128>}, {pipeline_mode = #tpu.pipeline_mode<synchronous>, transform_indices = @transform_2, window_bounds = array<i64: 1, 128>}, {transform_indices = @transform_3, window_bounds = array<i64: 8, 1>}]} {
    %c0 = arith.constant 0 : index
    %c0_0 = arith.constant 0 : index
    %0 = vector.load %arg1[%c0, %c0_0] : memref<8x128xbf16, #tpu.memory_space<vmem>>, vector<8x128xbf16>
    %1 = arith.extf %0 : vector<8x128xbf16> to vector<8x128xf32>
    %2 = arith.negf %1 : vector<8x128xf32>
    %3 = math.exp %2 : vector<8x128xf32>
    %cst = arith.constant 1.000000e+00 : f32
    %4 = vector.broadcast %cst : f32 to vector<8x128xf32>
    %5 = arith.addf %4, %3 : vector<8x128xf32>
    %6 = arith.divf %4, %5 : vector<8x128xf32>
    %7 = arith.truncf %6 : vector<8x128xf32> to vector<8x128xbf16>
    %c0_1 = arith.constant 0 : index
    %c0_2 = arith.constant 0 : index
    %8 = vector.load %arg2[%c0_1, %c0_2] : memref<128x128xbf16, #tpu.memory_space<vmem>>, vector<128x128xbf16>
    %cst_3 = arith.constant dense<0.000000e+00> : vector<8x128xf32>
    %9 = tpu.matmul %7, %8, %cst_3 {dimension_numbers = #tpu.dot_dimension_numbers<[1], [0], [0], [1], [0, 0, 1, 1], [], []>} : vector<8x128xbf16>, vector<128x128xbf16>, vector<8x128xf32> -> vector<8x128xf32>
    %c0_4 = arith.constant 0 : index
    %c0_5 = arith.constant 0 : index
    %10 = vector.load %arg3[%c0_4, %c0_5] : memref<1x128xf32, #tpu.memory_space<vmem>>, vector<1x128xf32>
    %11 = vector.broadcast %10 : vector<1x128xf32> to vector<8x128xf32>
    %12 = arith.addf %9, %11 : vector<8x128xf32>
    %cst_6 = arith.constant 0.000000e+00 : f32
    %cst_7 = arith.constant 1.000000e+00 : f32
    %13 = vector.broadcast %cst_6 : f32 to vector<8x128xf32>
    %14 = arith.maximumf %13, %12 : vector<8x128xf32>
    %15 = vector.broadcast %cst_7 : f32 to vector<8x128xf32>
    %16 = arith.minimumf %15, %14 : vector<8x128xf32>
    %cst_8 = arith.constant 1.000000e-30 : f32
    %17 = vector.broadcast %cst_8 : f32 to vector<8x128xf32>
    %18 = arith.maximumf %16, %17 : vector<8x128xf32>
    %19 = math.log %18 : vector<8x128xf32>
    %cst_9 = arith.constant dense<0.000000e+00> : vector<8xf32>
    %20 = vector.multi_reduction <add>, %19, %cst_9 [1] : vector<8x128xf32> to vector<8xf32>
    %21 = vector.shape_cast %20 : vector<8xf32> to vector<8x1xf32>
    %22 = math.exp %21 : vector<8x1xf32>
    %c0_10 = arith.constant 0 : index
    %c0_11 = arith.constant 0 : index
    %23 = vector.load %arg4[%c0_10, %c0_11] : memref<8x1xf32, #tpu.memory_space<vmem>>, vector<8x1xf32>
    tpu.vector_store %arg4[%c0_10, %c0_11], %22 {strides = array<i32>} : memref<8x1xf32, #tpu.memory_space<vmem>>, vector<8x1xf32>,
    return
  }
  func.func @transform_0(%arg0: i32) -> (i32, i32) {
    %c0_i32 = arith.constant 0 : i32
    %c0_i32_0 = arith.constant 0 : i32
    return %arg0, %c0_i32 : i32, i32
  }
  func.func @transform_1(%arg0: i32) -> (i32, i32) {
    %c0_i32 = arith.constant 0 : i32
    %c0_i32_0 = arith.constant 0 : i32
    %c0_i32_1 = arith.constant 0 : i32
    return %c0_i32, %c0_i32_0 : i32, i32
  }
  func.func @transform_2(%arg0: i32) -> (i32, i32) {
    %c0_i32 = arith.constant 0 : i32
    %c0_i32_0 = arith.constant 0 : i32
    %c0_i32_1 = arith.constant 0 : i32
    return %c0_i32, %c0_i32_0 : i32, i32
  }
  func.func @transform_3(%arg0: i32) -> (i32, i32) {
    %c0_i32 = arith.constant 0 : i32
    %c0_i32_0 = arith.constant 0 : i32
    return %arg0, %c0_i32 : i32, i32
  }
}

</mosaic_0001>

<bundles_post_ra>
// kernel: tpu_custom_call.1
= control target key start
LH: loop header
LB: loop body
LE: loop exit
PB: predicated region body
PF: predicated region fallthrough
CT: control target
= control target key end

     0   :  { %8 = vsyncpa [#allocation3], 0  ;;  %s350_s0 = inlined_call_operand.hbm [shape: bf16[8,128], index: 0, kind: input, shape index: {}]   ;;  %s351_s1 = inlined_call_operand.hbm [shape: bf16[128,128], index: 1, kind: input, shape index: {}]   ;;  %s352_s2 = inlined_call_operand.vmem [shape: f32[1,128], index: 2, kind: input, shape index: {}]   ;;  %s353_s3 = inlined_call_operand.vmem [shape: f32[8,1], index: 3, kind: output, shape index: {}]  }
   0x1   :  { %9 = vsyncpa [#allocation5], 0  ;;  %s287_s12 = smov [#allocation2]   ;;  %s288_s14 = smov [#allocation4]  }
   0x2   :  { %s16_s13 = sshll.u32 %s287_s12, 4  ;;  %s25_s15 = sshll.u32 %s288_s14, 4  ;;  %s17_s13 = int_to_ptr.vmem [resolvable:$true] %s16_s13  ;;  %s313_s15 = int_to_ptr.vmem [resolvable:$true] %s25_s15 }
   0x3   :  { %s239_s18 = scalar_lea.hbm %s350_s0, 64 }
   0x4   :  { %p240_p0 = scmp.ne.s32.totalorder %s350_s0, %s239_s18  ;;  %p243_p1 = scmp.lt.u32.totalorder %s239_s18, %s350_s0 }
   0x6   :  { %p245_p2 = pnand %p243_p1, %p240_p0 }
   0x8   :  { %248 = shalt.err (!%p245_p2)
}
   0x9   :  { %s249_s23 = scalar_lea.vmem %s17_s13, 64  ;;  %p254_p4 = scmp.lt.s32.totalorder %s17_s13, %s17_s13 }
   0xa   :  { %p250_p3 = scmp.ne.s32.totalorder %s17_s13, %s249_s23  ;;  %p255_p5 = scmp.lt.s32.totalorder %s249_s23, %s249_s23 }
   0xc   :  { %p256_p6 = por %p255_p5, %p254_p4 }
   0xe   :  { %p257_p7 = pnand %p256_p6, %p250_p3 }
  0x10   :  { %260 = shalt.err (!%p257_p7)
}
  0x11   :  { %19 = dma.hbm_to_vmem [thread:$0]  %s350_s0, 64, %s17_s13, [#allocation3]  }
  0x12   :  { %s261_s28 = scalar_lea.hbm %s351_s1, 1024 }
  0x13   :  { %p262_p8 = scmp.ne.s32.totalorder %s351_s1, %s261_s28  ;;  %p265_p9 = scmp.lt.u32.totalorder %s261_s28, %s351_s1 }
  0x15   :  { %p267_p10 = pnand %p265_p9, %p262_p8 }
  0x17   :  { %270 = shalt.err (!%p267_p10)
}
  0x18   :  { %s271_s6 = scalar_lea.vmem %s313_s15, 1024  ;;  %p276_p12 = scmp.lt.s32.totalorder %s313_s15, %s313_s15 }
  0x19   :  { %p272_p11 = scmp.ne.s32.totalorder %s313_s15, %s271_s6  ;;  %p277_p13 = scmp.lt.s32.totalorder %s271_s6, %s271_s6 }
  0x1b   :  { %p278_p0 = por %p277_p13, %p276_p12 }
  0x1d   :  { %p279_p1 = pnand %p278_p0, %p272_p11 }
  0x1f   :  { %282 = shalt.err (!%p279_p1)
}
  0x20   :  { %s289_s0 = smov 64   ;;  %s290_s7 = smov 4  }
  0x21   :  { %31 = dma.hbm_to_vmem [thread:$0]  %s351_s1, 1024, %s313_s15, [#allocation5], %s289_s0, %s289_s0, %s290_s7  }
  0x22   :  { %283 = dma.done.wait [#allocation3], 64  }
  0x23   :  { %284 = vsyncadd [#allocation3], 4294967232 }
  0x24   :  { %285 = dma.done.wait [#allocation5], 1024  }
  0x25   :  { %286 = vsyncadd [#allocation5], 4294966272  ;;  %v291_v0 = vmov 0.0   ;;  %vm292_vm0 = vmmov 0   ;;  %v223_v1 = vld [vmem:[#allocation4] sm:$0xff]   ;;  %v224_v2 = vld [vmem:[#allocation4 + $0x8] sm:$0xff]  }
  0x26   :  { %197 = vmatprep.subr.bf16.mxu0 %v291_v0  ;;  %213 = vmatprep.mubr.msk.bf16.mxu0 %vm292_vm0, %v291_v0  ;;  %v225_v3 = vld [vmem:[#allocation4 + $0x10] sm:$0xff]   ;;  %v41_v4 = vld [vmem:[#allocation2] sm:$0xf]  ;;  %v227_v8 = vld [vmem:[#allocation4 + $0x20] sm:$0xff]   ;;  %vm170_vm1 = vcmask 7168  }
  0x27   :  { %198 = vmatpush3.bf16.msra.mxu0 %v223_v1  ;;  %v42_v5 = vunpack.c.l.bf16 %v41_v4  ;;  %v226_v6 = vld [vmem:[#allocation4 + $0x18] sm:$0xff]   ;;  %v228_v9 = vld [vmem:[#allocation4 + $0x28] sm:$0xff]   ;;  %v229_v10 = vld [vmem:[#allocation4 + $0x30] sm:$0xff]  }
  0x28   :  { %199 = vmatprep.subr.bf16.mxu0 %v291_v0  ;;  %v230_v13 = vld [vmem:[#allocation4 + $0x38] sm:$0xff]   ;;  %v179_v16 = vld [vmem:[%s352_s2] ss:$0 sm:$0xff] }
  0x29   :  { %v178_v7 = vmul.f32 -1.442695, %v42_v5 }
  0x2b   :  { %200 = vmatpush3.bf16.msra.mxu0 %v224_v2  ;;  %231 = vpow2.f32 %v178_v7 }
  0x2c   :  { %201 = vmatprep.subr.bf16.mxu0 %v291_v0 }
  0x2f   :  { %202 = vmatpush3.bf16.msra.mxu0 %v225_v3 }
  0x30   :  { %203 = vmatprep.subr.bf16.mxu0 %v291_v0 }
  0x33   :  { %204 = vmatpush3.bf16.msra.mxu0 %v226_v6 }
  0x34   :  { %205 = vmatprep.subr.bf16.mxu0 %v291_v0 }
  0x35   :  { %v232_v11 = vpop.eup %231 }
  0x36   :  { %v46_v12 = vadd.f32 1.0, %v232_v11 }
  0x37   :  { %206 = vmatpush3.bf16.msra.mxu0 %v227_v8 }
  0x38   :  { %207 = vmatprep.subr.bf16.mxu0 %v291_v0  ;;  %233 = vrcp.f32 %v46_v12 }
  0x3b   :  { %208 = vmatpush3.bf16.msra.mxu0 %v228_v9 }
  0x3c   :  { %209 = vmatprep.subr.bf16.mxu0 %v291_v0 }
  0x3f   :  { %210 = vmatpush3.bf16.msra.mxu0 %v229_v10 }
  0x40   :  { %211 = vmatprep.subr.bf16.mxu0 %v291_v0 }
  0x42   :  { %v234_v14 = vpop.eup %233 }
  0x43   :  { %212 = vmatpush3.bf16.msra.mxu0 %v230_v13  ;;  %v49_v15 = vpack.c.bf16 %v234_v14, %v234_v14 }
  0x46   :  { %214 = vmatmul.mubr.bf16.vlgmr.msra.gmra.mrb[0].mxu0 %v49_v15 }
 0x119   :  { %v155_v17 = vpop.f32.mrb[0].mxu0 }
 0x11a   :  { %v156_v18 = vadd.f32 %v179_v16, %v155_v17  ;;  %v215_v19 = vpop.f32.mrb[1].mxu0 }
 0x11b   :  { %v158_v20 = vpop.f32.mrb[2].mxu0 }
 0x11c   :  { %v161_v21 = vmax.f32 %v156_v18, 0.0  ;;  %v216_v22 = vpop.f32.mrb[3].mxu0 }
 0x11e   :  { %v162_v23 = vmin.f32 %v161_v21, 1.0 }
 0x120   :  { %v163_v24 = vmax.f32 %v162_v23, 1e-30 }
 0x122   :  { %235 = vlog2.f32 %v163_v24 }
 0x12c   :  { %v236_v25 = vpop.eup %235 }
 0x12d   :  { %v165_v26 = vmul.f32 0.6931472, %v236_v25 }
 0x12f   :  { %166 = vadd.xlane.f32.xlu0 %v165_v26 }
 0x1bc   :  { %v167_v27 = vpop.xlane.xlu0 %166 }
 0x1bd   :  { %v168_v28 = vmul.f32 1.442695, %v167_v27 }
 0x1bf   :  { %237 = vpow2.f32 %v168_v28 }
 0x1c9   :  { %v238_v29 = vpop.eup %237 }
 0x1ca   :  { %171 = vst.msk [vmem:[%s353_s3] sm:$0xff] %vm170_vm1, %v238_v29 }
 0x1cb   :  { %176 = vsyncpa [#allocation3], 1 }
 0x1cc   :  { %177 = vsyncpa [#allocation5], 1 }

</bundles_post_ra>
